<compile_context>
chip_gen: v5e
topology: v5e:2x2
jax: 0.10.0
libtpu: 0.0.40
codegen_flags: <defaults>
</compile_context>

<pallas_src>
import inspect

import jax
import jax.numpy as jnp
from jax.experimental import pallas as pl
from jax.experimental.pallas import tpu as pltpu


def _reduce_state_kernel(h_ref, c_ref, h_out_ref, c_out_ref):
    # h_ref, c_ref: (L, T) blocks; out refs: (1, T) blocks.
    # Single-pass in-kernel reduction over L, accumulated in float32.
    h_sum = jnp.sum(h_ref[...].astype(jnp.float32), axis=0, keepdims=True)
    c_sum = jnp.sum(c_ref[...].astype(jnp.float32), axis=0, keepdims=True)
    h_out_ref[...] = h_sum.astype(h_out_ref.dtype)
    c_out_ref[...] = c_sum.astype(c_out_ref.dtype)


def _sublane_pack(itemsize):
    # Sublane packing factor: 8 for 4-byte, 16 for 2-byte, 32 for 1-byte dtypes.
    return {1: 32, 2: 16, 4: 8}.get(int(itemsize), 8)


def _round_down_128(x):
    return (x // 128) * 128


_BLOCKSPEC_HAS_PIPELINE_MODE = (
    hasattr(pl, "Buffered")
    and "pipeline_mode" in inspect.signature(pl.BlockSpec).parameters
)


def reduce_state(h, c, *, force_kernel=False, small_bytes_threshold=1 << 20):
    """Sum h and c over dim 0 with keepdim=True. h, c: (L, B, H) -> (1, B, H)."""
    assert h.shape == c.shape, "h and c must have the same shape"
    L, B, H = h.shape
    N = B * H

    # Degenerate cases.
    if L == 0 or N == 0:
        return (jnp.zeros((1, B, H), h.dtype), jnp.zeros((1, B, H), c.dtype))

    itemsize = max(jnp.dtype(h.dtype).itemsize, jnp.dtype(c.dtype).itemsize)
    total_bytes = 2 * L * N * itemsize

    # Tiny inputs: launch + output DMA overhead dominates; let XLA fuse it.
    if not force_kernel and total_bytes < small_bytes_threshold:
        return (jnp.sum(h, axis=0, keepdims=True),
                jnp.sum(c, axis=0, keepdims=True))

    h_flat = h.reshape(L, N)
    c_flat = c.reshape(L, N)

    pack = _sublane_pack(itemsize)
    L_pad = ((L + pack - 1) // pack) * pack  # sublane-padded reduction length

    if N < 128:
        # Genuinely tiny feature axis: one full-extent block (always legal
        # w.r.t. the (8,128) rule since both dims equal the array extents).
        T = N
    else:
        # Adaptive lane tile: ~2 MiB per input block (padded-L aware).
        target_block_bytes = 2 << 20
        max_block_bytes = 4 << 20
        T = _round_down_128(target_block_bytes // (L_pad * itemsize))
        T = max(T, 1024)
        # Per-block hard cap (matters for very large L).
        T = min(T, max(128, _round_down_128(max_block_bytes // (L_pad * itemsize))))
        # Ensure >= 2 grid steps for large N so v7x's 2 TCs both participate.
        two_step_cap = pl.cdiv(pl.cdiv(N, 2), 128) * 128
        T = min(T, max(128, two_step_cap))
        # Never let the block exceed the array's lane extent; the ragged tail
        # (N % T) is handled by Pallas edge-block masking -- no jnp.pad.
        T = min(T, _round_down_128(N))
        T = max(T, 128)

    grid_steps = pl.cdiv(N, T)

    # Padded VMEM footprint per block.
    in_block_bytes = L_pad * T * itemsize
    out_block_bytes = pack * T * itemsize  # 1 output sublane pads to `pack`

    # Optional 3-deep input buffering when it clearly fits and is useful.
    use_buffered3 = (
        _BLOCKSPEC_HAS_PIPELINE_MODE
        and grid_steps >= 3
        and (2 * 3 * in_block_bytes + 2 * 2 * out_block_bytes) <= (24 << 20)
    )
    in_bufs = 3 if use_buffered3 else 2

    working = 2 * in_bufs * in_block_bytes + 2 * 2 * out_block_bytes
    # Headroom, but stay <= 40 MiB so v7x's 64 MiB VMEM is never at risk.
    vmem_limit = int(min(max(working * 3 // 2 + (2 << 20), 8 << 20), 40 << 20))

    spec_kwargs = {"pipeline_mode": pl.Buffered(3)} if use_buffered3 else {}
    in_spec = pl.BlockSpec((L, T), lambda j: (0, j), **spec_kwargs)
    out_spec = pl.BlockSpec((1, T), lambda j: (0, j))

    h_out, c_out = pl.pallas_call(
        _reduce_state_kernel,
        out_shape=(
            jax.ShapeDtypeStruct((1, N), h.dtype),
            jax.ShapeDtypeStruct((1, N), c.dtype),
        ),
        grid_spec=pltpu.PrefetchScalarGridSpec(
            num_scalar_prefetch=0,
            grid=(grid_steps,),
            in_specs=[in_spec, in_spec],
            out_specs=(out_spec, out_spec),
        ),
        compiler_params=pltpu.CompilerParams(
            # Independent lane tiles -> parallel (shards across v7x's 2 TCs).
            dimension_semantics=("parallel",),
            vmem_limit_bytes=vmem_limit,
        ),
    )(h_flat, c_flat)

    return h_out.reshape(1, B, H), c_out.reshape(1, B, H)


if __name__ == "__main__":
    # ReduceState has no parameters (its __init__ is empty), so nothing to init.
    key = jax.random.PRNGKey(0)
    kh, kc, kh2, kc2, kh3, kc3 = jax.random.split(key, 6)

    # Case 1: real LSTM-state-sized input -> tiny-input short-circuit path.
    L, B, H = 2, 2, 32
    h = jax.random.normal(kh, (L, B, H), dtype=jnp.float32)
    c = jax.random.normal(kc, (L, B, H), dtype=jnp.float32)
    h_red, c_red = reduce_state(h, c)
    jax.block_until_ready((h_red, c_red))
    assert h_red.shape == (1, B, H) and c_red.shape == (1, B, H)
    assert jnp.allclose(h_red, jnp.sum(h, axis=0, keepdims=True), atol=1e-6)
    assert jnp.allclose(c_red, jnp.sum(c, axis=0, keepdims=True), atol=1e-6)

    # Case 2: lane-dense tiled Pallas path (force the kernel at small shapes).
    L2, B2, H2 = 4, 8, 512  # N = 4096 -> two lane-dense tiles
    h2 = jax.random.normal(kh2, (L2, B2, H2), dtype=jnp.float32)
    c2 = jax.random.normal(kc2, (L2, B2, H2), dtype=jnp.float32)
    h2_red, c2_red = reduce_state(h2, c2, force_kernel=True)
    jax.block_until_ready((h2_red, c2_red))
    assert jnp.allclose(h2_red, jnp.sum(h2, axis=0, keepdims=True), atol=1e-5)
    assert jnp.allclose(c2_red, jnp.sum(c2, axis=0, keepdims=True), atol=1e-5)

    # Case 3: bf16 inputs, f32 in-kernel accumulation, cast on final store.
    hb = h2.astype(jnp.bfloat16)
    cb = c2.astype(jnp.bfloat16)
    hb_red, cb_red = reduce_state(hb, cb, force_kernel=True)
    jax.block_until_ready((hb_red, cb_red))
    refb = jnp.sum(hb.astype(jnp.float32), axis=0, keepdims=True).astype(jnp.bfloat16)
    assert jnp.allclose(hb_red.astype(jnp.float32), refb.astype(jnp.float32),
                        atol=5e-2, rtol=5e-2)

    # Case 4: ragged N (not a multiple of 128) -> edge-block masking, no pad.
    L3, B3, H3 = 3, 2, 200  # N = 400
    h3 = jax.random.normal(kh3, (L3, B3, H3), dtype=jnp.float32)
    c3 = jax.random.normal(kc3, (L3, B3, H3), dtype=jnp.float32)
    h3_red, c3_red = reduce_state(h3, c3, force_kernel=True)
    jax.block_until_ready((h3_red, c3_red))
    assert jnp.allclose(h3_red, jnp.sum(h3, axis=0, keepdims=True), atol=1e-5)
    assert jnp.allclose(c3_red, jnp.sum(c3, axis=0, keepdims=True), atol=1e-5)

    print("KERNEL_OK")
</pallas_src>

<mosaic_0001>
module attributes {stable_mosaic.version = 11 : i64} {
  func.func @_reduce_state_kernel(%arg0: i32, %arg1: memref<4x2048xf32, #tpu.memory_space<vmem>>, %arg2: memref<4x2048xf32, #tpu.memory_space<vmem>>, %arg3: memref<1x2048xf32, #tpu.memory_space<vmem>>, %arg4: memref<1x2048xf32, #tpu.memory_space<vmem>>) attributes {dimension_semantics = [#tpu.dimension_semantics<parallel>], iteration_bounds = array<i64: 2>, scalar_prefetch = 0 : i64, scratch_operands = 0 : i64, tpu.core_type = #tpu.core_type<tc>, window_params = [{transform_indices = @transform_0, window_bounds = array<i64: 4, 2048>}, {transform_indices = @transform_1, window_bounds = array<i64: 4, 2048>}, {transform_indices = @transform_2, window_bounds = array<i64: 1, 2048>}, {transform_indices = @transform_3, window_bounds = array<i64: 1, 2048>}]} {
    %c0 = arith.constant 0 : index
    %c0_0 = arith.constant 0 : index
    %0 = vector.load %arg1[%c0, %c0_0] : memref<4x2048xf32, #tpu.memory_space<vmem>>, vector<4x2048xf32>
    %cst = arith.constant dense<0.000000e+00> : vector<2048xf32>
    %1 = vector.multi_reduction <add>, %0, %cst [0] : vector<4x2048xf32> to vector<2048xf32>
    %2 = vector.shape_cast %1 : vector<2048xf32> to vector<1x2048xf32>
    %c0_1 = arith.constant 0 : index
    %c0_2 = arith.constant 0 : index
    %3 = vector.load %arg2[%c0_1, %c0_2] : memref<4x2048xf32, #tpu.memory_space<vmem>>, vector<4x2048xf32>
    %cst_3 = arith.constant dense<0.000000e+00> : vector<2048xf32>
    %4 = vector.multi_reduction <add>, %3, %cst_3 [0] : vector<4x2048xf32> to vector<2048xf32>
    %5 = vector.shape_cast %4 : vector<2048xf32> to vector<1x2048xf32>
    %c0_4 = arith.constant 0 : index
    %c0_5 = arith.constant 0 : index
    %6 = vector.load %arg3[%c0_4, %c0_5] : memref<1x2048xf32, #tpu.memory_space<vmem>>, vector<1x2048xf32>
    tpu.vector_store %arg3[%c0_4, %c0_5], %2 {strides = array<i32>} : memref<1x2048xf32, #tpu.memory_space<vmem>>, vector<1x2048xf32>,
    %c0_6 = arith.constant 0 : index
    %c0_7 = arith.constant 0 : index
    %7 = vector.load %arg4[%c0_6, %c0_7] : memref<1x2048xf32, #tpu.memory_space<vmem>>, vector<1x2048xf32>
    tpu.vector_store %arg4[%c0_6, %c0_7], %5 {strides = array<i32>} : memref<1x2048xf32, #tpu.memory_space<vmem>>, vector<1x2048xf32>,
    return
  }
  func.func @transform_0(%arg0: i32) -> (i32, i32) {
    %c0_i32 = arith.constant 0 : i32
    %c0_i32_0 = arith.constant 0 : i32
    return %c0_i32, %arg0 : i32, i32
  }
  func.func @transform_1(%arg0: i32) -> (i32, i32) {
    %c0_i32 = arith.constant 0 : i32
    %c0_i32_0 = arith.constant 0 : i32
    return %c0_i32, %arg0 : i32, i32
  }
  func.func @transform_2(%arg0: i32) -> (i32, i32) {
    %c0_i32 = arith.constant 0 : i32
    %c0_i32_0 = arith.constant 0 : i32
    return %c0_i32, %arg0 : i32, i32
  }
  func.func @transform_3(%arg0: i32) -> (i32, i32) {
    %c0_i32 = arith.constant 0 : i32
    %c0_i32_0 = arith.constant 0 : i32
    return %c0_i32, %arg0 : i32, i32
  }
}

</mosaic_0001>

<bundles_post_ra>
// kernel: tpu_custom_call.1
= control target key start
LH: loop header
LB: loop body
LE: loop exit
PB: predicated region body
PF: predicated region fallthrough
CT: control target
= control target key end

     0   :  { %9 = vsyncpa [#allocation3], 0  ;;  %s1416_s0 = inlined_call_operand.hbm [shape: f32[4,4096], index: 0, kind: input, shape index: {}]   ;;  %s1417_s1 = inlined_call_operand.hbm [shape: f32[4,4096], index: 1, kind: input, shape index: {}]   ;;  %s1418_s2 = inlined_call_operand.hbm [shape: f32[1,4096], index: 2, kind: output, shape index: {0}]   ;;  %s1419_s3 = inlined_call_operand.hbm [shape: f32[1,4096], index: 3, kind: output, shape index: {1}]  }
   0x1   :  { %11 = vsyncpa [#allocation3 + $0x1], 0 }
   0x2   :  { %12 = vsyncpa [#allocation6], 0 }
   0x3   :  { %14 = vsyncpa [#allocation6 + $0x1], 0 }
   0x4   :  { %15 = vsyncpa [#allocation4], 0 }
   0x5   :  { %17 = vsyncpa [#allocation4 + $0x1], 0 }
   0x6   :  { %18 = vsyncpa [#allocation9], 0 }
   0x7   :  { %20 = vsyncpa [#allocation9 + $0x1], 0  ;;  %s1112_s12 = smov 0   ;;  %s1114_s13 = smov 0  }
   0x8   :  { %s1116_s14 = smov 0   ;;  %s1118_s15 = smov 0  }
   0x9 LB: > { %s1133_s16 = sadd.s32 4294967295, %s1090_s15   ;;  %s850_s17 = sadd.s32 4294967294, %s1090_s15   ;;  %s1090_s15 = sphi %s1118_s15, %s1430_s15   ;;  %s1086_s14 = sphi %s1116_s14, %s1429_s14   ;;  %s1082_s13 = sphi %s1114_s13, %s1428_s13   ;;  %s1078_s12 = sphi %s1112_s12, %s1427_s12  }
   0xa   : > { %s1137_s18 = sadd.s32 1, %s1090_s15   ;;  %s33_s19 = sadd.s32 1, %s1086_s14 }
   0xb   : > { %s30_s20 = ssub.s32 %s1090_s15, %s1137_s18  ;;  %p40_p0 = scmp.ne.s32.totalorder %s1086_s14, %s1082_s13 }
   0xc   : > { %p31_p1 = scmp.eq.s32.totalorder %s30_s20, 0  ;;  %p41_p2 = scmp.eq.s32.totalorder %s1090_s15, 0 }
   0xd   : > { %p46_p3 = scmp.ne.s32.totalorder %s1082_s13, %s1078_s12  ;;  %p47_p4 = scmp.eq.s32.totalorder %s1133_s16, 0 }
   0xe   : > { %s1149_s21 = scalar_select %p31_p1, %s1086_s14, %s33_s19  }
   0xf   : > { %p1151_p5 = por %p41_p2, %p40_p0  ;;  %p1155_p6 = por %p47_p4, %p46_p3 }
  0x10   : > { %p96_p7 = scmp.eq.s32.totalorder %s1133_s16, 1  ;;  %p102_p8 = scmp.eq.s32.totalorder %s850_s17, 1 }
  0x11   : > { %p894_p10 = scmp.lt.s32.totalorder %s1090_s15, 2  ;;  %s1171_s26 = sand.u32 1, %s1086_s14  }
  0x12   : > { %p1162_p11 = por %p96_p7, %p40_p0  ;;  %p1166_p12 = por %p102_p8, %p46_p3 }
  0x13   : > { %s870_s27 = sshll.u32 %s1090_s15, 6  ;;  %s853_s28 = sshll.u32 %s1171_s26, 6 }
  0x14   : > { %s157_s4 = scalar_lea.hbm %s1416_s0, %s870_s27  ;;  %s152_s6 = scalar_lea.vmem [#allocation2], %s853_s28 }
  0x15   : > { %s159_s5 = sshll.u32 %s157_s4, 4  ;;  %s161_s7 = sshll.u32 %s152_s6, 4  ;;  %s160_s5 = int_to_ptr.hbm [resolvable:$true] %s159_s5  ;;  %s162_s7 = int_to_ptr.vmem [resolvable:$true] %s161_s7 }
  0x16   : > { %p1180_p13 = pnand %p894_p10, %p1151_p5  ;;  %p859_p0 = scmp.ge.s32.totalorder %s1090_s15, 1 }
  0x17   : > { %p186_p1 = scmp.lt.s32.totalorder %s1090_s15, 3  ;;  %s149_s9 = scalar_lea.sflag [#allocation3], %s1171_s26 }
  0x18   : > { %s928_s10 = sshra.s32 %s160_s5, 4  ;;  %p932_p3 = pneg %p1180_p13  ;;  %s929_s10 = int_to_ptr.hbm [resolvable:$true] %s928_s10 }
  0x19   : > { %s930_s11 = scalar_lea.hbm %s929_s10, 64  ;;  %s935_s20 = scalar_lea.hbm %s1416_s0, 128 }
  0x1a   : > { %p931_p2 = scmp.ne.s32.totalorder %s929_s10, %s930_s11  ;;  %p936_p5 = scmp.lt.s32.totalorder %s929_s10, %s1416_s0 }
  0x1b   : > { %p937_p8 = scmp.lt.s32.totalorder %s935_s20, %s930_s11 }
  0x1c   : > { %p933_p4 = pnand %p932_p3, %p931_p2 }
  0x1d   : > { %p938_p10 = por %p937_p8, %p936_p5 }
  0x1e   : > { %p934_p7 = pneg %p933_p4 }
  0x20   : > { %p939_p9 = pnand %p938_p10, %p934_p7 }
  0x22   : > { %942 = shalt.err (!%p939_p9)
}
  0x23   : > { %883 = dma.hbm_to_vmem [thread:$0]  (!%p1180_p13), %s160_s5, 1024, %s162_s7, %s149_s9  }
  0x24   : > { %p1204_p2 = pnand %p859_p0, %p186_p1  ;;  %s177_s10 = scalar_lea.hbm %s1417_s1, %s870_s27 }
  0x25   : > { %s179_s11 = sshll.u32 %s177_s10, 4  ;;  %s172_s17 = scalar_lea.vmem [#allocation5], %s853_s28  ;;  %s180_s11 = int_to_ptr.hbm [resolvable:$true] %s179_s11 }
  0x26   : > { %s181_s19 = sshll.u32 %s172_s17, 4  ;;  %s169_s20 = scalar_lea.sflag [#allocation6], %s1171_s26  ;;  %s182_s19 = int_to_ptr.vmem [resolvable:$true] %s181_s19 }
  0x27   : > { %s958_s22 = sshra.s32 %s180_s11, 4  ;;  %s965_s9 = scalar_lea.hbm %s1417_s1, 128  ;;  %s959_s22 = int_to_ptr.hbm [resolvable:$true] %s958_s22 }
  0x28   : > { %s960_s29 = scalar_lea.hbm %s959_s22, 64  ;;  %p966_p4 = scmp.lt.s32.totalorder %s959_s22, %s1417_s1 }
  0x29   : > { %p961_p9 = scmp.ne.s32.totalorder %s959_s22, %s960_s29  ;;  %p967_p7 = scmp.lt.s32.totalorder %s965_s9, %s960_s29 }
  0x2b   : > { %p963_p0 = pnand %p961_p9, %p932_p3  ;;  %p968_p5 = por %p967_p7, %p966_p4 }
  0x2d   : > { %p964_p1 = pneg %p963_p0 }
  0x2f   : > { %p969_p8 = pnand %p968_p5, %p964_p1 }
  0x31   : > { %972 = shalt.err (!%p969_p8)
}
  0x32   : > { %886 = dma.hbm_to_vmem [thread:$0]  (!%p1180_p13), %s180_s11, 1024, %s182_s19, %s169_s20  }
  0x33   : > { %190 = sbr.rel (%p1204_p2) target bundleno = 154 (0x9a), region = 28  ;;  %s1226_s26 = sand.u32 (!%p1204_p2), 1, %s1082_s13  }
  0x34   : > { %s860_s28 = sshll.u32 (!%p1204_p2), %s1226_s26, 6  ;;  %s193_s6 = scalar_lea.sflag (!%p1204_p2), [#allocation3], %s1226_s26 }
  0x35   : > { %s1230_s10 = scalar_lea.vmem (!%p1204_p2), [#allocation2], %s860_s28 }
  0x38   : > { %1061 = dma.done.wait (%p1155_p6), %s193_s6, 1024  }
  0x39   : > { %1063 = vsyncadd (%p1155_p6), %s193_s6, 4294966272  ;;  %s203_s8 = scalar_lea.sflag [#allocation6], %s1226_s26  ;;  %s1237_s30 = scalar_lea.vmem [#allocation5], %s860_s28 }
  0x3a   : > { %1065 = dma.done.wait (%p1155_p6), %s203_s8, 1024  }
  0x3b   : > { %1067 = vsyncadd (%p1155_p6), %s203_s8, 4294966272  ;;  %v244_v0 = vld [vmem:[%s1230_s10] sm:$0xff]  ;;  %v245_v1 = vld [vmem:[%s1230_s10 + $0x8] sm:$0xff]  ;;  %vm303_vm0 = vcmask 1043456   ;;  %vm617_vm1 = vcmask 1040384   ;;  %vm619_vm2 = vcmask 1042434  }
  0x3c   : > { %v246_v2 = vld [vmem:[%s1230_s10 + $0x10] sm:$0xff]  ;;  %260 = vst [vmem:[#allocation1] ss:$2 sm:$0xff] %v244_v0  ;;  %v247_v3 = vld [vmem:[%s1230_s10 + $0x18] sm:$0xff]  ;;  %v248_v4 = vld [vmem:[%s1230_s10 + $0x20] sm:$0xff]  ;;  %vm621_vm3 = vcmask 1041408  }
  0x3d   : > { %262 = vst [vmem:[#allocation1 + $0x10] ss:$2 sm:$0xff] %v245_v1  ;;  %v249_v9 = vld [vmem:[%s1230_s10 + $0x28] sm:$0xff]  ;;  %v250_v19 = vld [vmem:[%s1230_s10 + $0x30] sm:$0xff]  ;;  %v251_v30 = vld [vmem:[%s1230_s10 + $0x38] sm:$0xff]  ;;  %vm623_vm4 = vcmask 1044484  }
  0x3e   : > { %264 = vst [vmem:[#allocation1 + $0x20] ss:$2 sm:$0xff] %v246_v2  ;;  %v416_v42 = vld [vmem:[%s1237_s30] sm:$0xff]  ;;  %v417_v55 = vld [vmem:[%s1237_s30 + $0x8] sm:$0xff]  ;;  %vm625_vm5 = vcmask 1046534   ;;  %s862_s23 = sshll.u32 %s1226_s26, 4 }
  0x3f   : > { %266 = vst [vmem:[#allocation1 + $0x30] ss:$2 sm:$0xff] %v247_v3  ;;  %vm627_vm6 = vcmask 1045508   ;;  %s1305_s11 = scalar_lea.vmem [#allocation7], %s862_s23  ;;  %s866_s17 = sshll.u32 %s1133_s16, 4 }
  0x40   : > { %s705_s22 = scalar_lea.hbm %s1418_s2, %s866_s17  ;;  %s707_s29 = sshll.u32 %s1305_s11, 4  ;;  %s1332_s29 = int_to_ptr.vmem [resolvable:$true] %s707_s29 }
  0x41   : > { %s709_s5 = sshll.u32 %s705_s22, 4  ;;  %s690_s7 = scalar_lea.sflag [#allocation4], %s1226_s26  ;;  %s710_s5 = int_to_ptr.hbm [resolvable:$true] %s709_s5 }
  0x42   : > { %s1002_s9 = sshra.s32 %s710_s5, 4  ;;  %s1008_s6 = scalar_lea.hbm %s1418_s2, 32  ;;  %s1003_s9 = int_to_ptr.hbm [resolvable:$true] %s1002_s9 }
  0x43   : > { %v267_v5 = vld.sshfl [vmem:[#allocation1] sm:$0xff pattern:$0x75316420]  ;;  %v268_v6 = vld.sshfl [vmem:[#allocation1 + $0x8] sm:$0xff pattern:$0x75316420]  ;;  %p1009_p10 = scmp.lt.s32.totalorder %s1003_s9, %s1418_s2 }
  0x44   : > { %275 = vst [vmem:[#allocation1] ss:$2 sm:$0xff] %v248_v4  ;;  %v304_v7 = vsel %vm303_vm0, %v267_v5, 0.0  ;;  %v311_v8 = vsel %vm303_vm0, %v268_v6, 0.0  ;;  %v418_v6 = vld [vmem:[%s1237_s30 + $0x10] sm:$0xff]  ;;  %s1004_s4 = scalar_lea.hbm %s1003_s9, 16 }
  0x45   : > { %v305_v10 = vrot.slane %v304_v7, 4  ;;  %v312_v11 = vrot.slane %v311_v8, 4  ;;  %v269_v12 = vld.sshfl [vmem:[#allocation1 + $0x10] sm:$0xff pattern:$0x75316420]  ;;  %p1005_p6 = scmp.ne.s32.totalorder %s1003_s9, %s1004_s4  ;;  %p1010_p2 = scmp.lt.s32.totalorder %s1008_s6, %s1004_s4 }
  0x46   : > { %v270_v13 = vld.sshfl [vmem:[#allocation1 + $0x18] sm:$0xff pattern:$0x75316420]  ;;  %v318_v14 = vsel %vm303_vm0, %v269_v12, 0.0 }
  0x47   : > { %v306_v15 = vadd.f32 %v305_v10, %v304_v7  ;;  %v313_v16 = vadd.f32 %v312_v11, %v311_v8  ;;  %276 = vst [vmem:[#allocation1 + $0x10] ss:$2 sm:$0xff] %v249_v9  ;;  %v319_v17 = vrot.slane %v318_v14, 4  ;;  %v325_v18 = vsel %vm303_vm0, %v270_v13, 0.0  ;;  %p1006_p13 = pnand %p1005_p6, %p1162_p11  ;;  %p1011_p9 = por %p1010_p2, %p1009_p10 }
  0x48   : > { %v326_v20 = vrot.slane %v325_v18, 4  ;;  %v271_v21 = vld.sshfl [vmem:[#allocation1 + $0x20] sm:$0xff pattern:$0x75316420] }
  0x49   : > { %v307_v22 = vrot.slane %v306_v15, 2  ;;  %v314_v23 = vrot.slane %v313_v16, 2  ;;  %v320_v24 = vadd.f32 %v319_v17, %v318_v14  ;;  %v272_v25 = vld.sshfl [vmem:[#allocation1 + $0x28] sm:$0xff pattern:$0x75316420]  ;;  %v332_v26 = vsel %vm303_vm0, %v271_v21, 0.0  ;;  %p1007_p3 = pneg %p1006_p13 }
  0x4a   : > { %v327_v27 = vadd.f32 %v326_v20, %v325_v18  ;;  %277 = vst [vmem:[#allocation1 + $0x20] ss:$2 sm:$0xff] %v250_v19  ;;  %v333_v28 = vrot.slane %v332_v26, 4  ;;  %v339_v29 = vsel %vm303_vm0, %v272_v25, 0.0  ;;  %v419_v19 = vld [vmem:[%s1237_s30 + $0x18] sm:$0xff] }
  0x4b   : > { %v321_v31 = vrot.slane %v320_v24, 2  ;;  %v340_v32 = vrot.slane %v339_v29, 4  ;;  %v273_v33 = vld.sshfl [vmem:[#allocation1 + $0x30] sm:$0xff pattern:$0x75316420]  ;;  %v315_v34 = vadd.f32 %v314_v23, %v313_v16  ;;  %v308_v43 = vadd.f32 %v307_v22, %v306_v15  ;;  %p1012_p0 = pnand %p1011_p9, %p1007_p3 }
  0x4c   : > { %v328_v35 = vrot.slane %v327_v27, 2  ;;  %v334_v36 = vadd.f32 %v333_v28, %v332_v26  ;;  %v274_v37 = vld.sshfl [vmem:[#allocation1 + $0x38] sm:$0xff pattern:$0x75316420]  ;;  %v346_v38 = vsel %vm303_vm0, %v273_v33, 0.0 }
  0x4d   : > { %v341_v39 = vadd.f32 %v340_v32, %v339_v29  ;;  %278 = vst [vmem:[#allocation1 + $0x30] ss:$2 sm:$0xff] %v251_v30  ;;  %v347_v40 = vrot.slane %v346_v38, 4  ;;  %v353_v41 = vsel %vm303_vm0, %v274_v37, 0.0  ;;  %v322_v44 = vadd.f32 %v321_v31, %v320_v24 }
  0x4e   : > { %v335_v45 = vrot.slane %v334_v36, 2  ;;  %v354_v46 = vrot.slane %v353_v41, 4  ;;  %v279_v47 = vld.sshfl [vmem:[#allocation1] sm:$0xff pattern:$0x75316420]  ;;  %v329_v48 = vadd.f32 %v328_v35, %v327_v27  ;;  %v316_v56 = vrot.slane %v315_v34, 1 }
  0x4f   : > { %v342_v49 = vrot.slane %v341_v39, 2  ;;  %v348_v50 = vadd.f32 %v347_v40, %v346_v38  ;;  %v280_v51 = vld.sshfl [vmem:[#allocation1 + $0x8] sm:$0xff pattern:$0x75316420]  ;;  %v1261_v53 = vsel %vm303_vm0, %v279_v47, 0.0  ;;  %v309_v61 = vrot.slane %v308_v43, 1 }
  0x50   : > { %v355_v52 = vadd.f32 %v354_v46, %v353_v41  ;;  %v367_v54 = vsel %vm303_vm0, %v280_v51, 0.0  ;;  %432 = vst [vmem:[#allocation1] ss:$2 sm:$0xff] %v416_v42  ;;  %v336_v57 = vadd.f32 %v335_v45, %v334_v36  ;;  %v281_v60 = vld.sshfl [vmem:[#allocation1 + $0x10] sm:$0xff pattern:$0x75316420]  ;;  %v317_v10 = vadd.f32 %v316_v56, %v315_v34 }
  0x51   : > { %v343_v58 = vadd.f32 %v342_v49, %v341_v39  ;;  %v349_v59 = vrot.slane %v348_v50, 2  ;;  %v282_v63 = vld.sshfl [vmem:[#allocation1 + $0x18] sm:$0xff pattern:$0x75316420]  ;;  %v374_v0 = vsel %vm303_vm0, %v281_v60, 0.0  ;;  %v323_v1 = vrot.slane %v322_v44, 1 }
  0x52   : > { %v356_v62 = vrot.slane %v355_v52, 2  ;;  %v361_v3 = vrot.slane %v1261_v53, 4  ;;  %v368_v4 = vrot.slane %v367_v54, 4  ;;  %v381_v5 = vsel %vm303_vm0, %v282_v63, 0.0  ;;  %434 = vst [vmem:[#allocation1 + $0x10] ss:$2 sm:$0xff] %v417_v55 }
  0x53   : > { %v350_v2 = vadd.f32 %v349_v59, %v348_v50  ;;  %v375_v8 = vrot.slane %v374_v0, 4  ;;  %v283_v9 = vld.sshfl [vmem:[#allocation1 + $0x20] sm:$0xff pattern:$0x75316420]  ;;  %v330_v11 = vrot.slane %v329_v48, 1  ;;  %v310_v14 = vadd.f32 %v309_v61, %v308_v43  ;;  %v420_v34 = vld [vmem:[%s1237_s30 + $0x20] sm:$0xff] }
  0x54   : > { %v357_v7 = vadd.f32 %v356_v62, %v355_v52  ;;  %v284_v12 = vld.sshfl [vmem:[#allocation1 + $0x28] sm:$0xff pattern:$0x75316420]  ;;  %v388_v13 = vsel %vm303_vm0, %v283_v9, 0.0  ;;  %v337_v15 = vrot.slane %v336_v57, 1  ;;  %v344_v16 = vrot.slane %v343_v58, 1 }
  0x55   : > { %v382_v17 = vrot.slane %v381_v5, 4  ;;  %v395_v18 = vsel %vm303_vm0, %v284_v12, 0.0  ;;  %436 = vst [vmem:[#allocation1 + $0x20] ss:$2 sm:$0xff] %v418_v6  ;;  %v324_v20 = vadd.f32 %v323_v1, %v322_v44  ;;  %v331_v21 = vadd.f32 %v330_v11, %v329_v48  ;;  %v421_v35 = vld [vmem:[%s1237_s30 + $0x28] sm:$0xff]  ;;  %v422_v40 = vld [vmem:[%s1237_s30 + $0x30] sm:$0xff] }
  0x56   : > { %v369_v22 = vadd.f32 %v368_v4, %v367_v54  ;;  %v389_v23 = vrot.slane %v388_v13, 4  ;;  %v396_v24 = vrot.slane %v395_v18, 4  ;;  %v285_v25 = vld.sshfl [vmem:[#allocation1 + $0x30] sm:$0xff pattern:$0x75316420]  ;;  %v351_v26 = vrot.slane %v350_v2, 1 }
  0x57   : > { %v286_v27 = vld.sshfl [vmem:[#allocation1 + $0x38] sm:$0xff pattern:$0x75316420]  ;;  %v402_v28 = vsel %vm303_vm0, %v285_v25, 0.0  ;;  %v338_v29 = vadd.f32 %v337_v15, %v336_v57  ;;  %v358_v30 = vrot.slane %v357_v7, 1  ;;  %v603_v31 = vrot.slane %v317_v10, 7 }
  0x58   : > { %v403_v32 = vrot.slane %v402_v28, 4  ;;  %v409_v33 = vsel %vm303_vm0, %v286_v27, 0.0  ;;  %438 = vst [vmem:[#allocation1 + $0x30] ss:$2 sm:$0xff] %v419_v19  ;;  %v345_v36 = vadd.f32 %v344_v16, %v343_v58  ;;  %v352_v37 = vadd.f32 %v351_v26, %v350_v2  ;;  %v423_v51 = vld [vmem:[%s1237_s30 + $0x38] sm:$0xff] }
  0x59   : > { %v410_v38 = vrot.slane %v409_v33, 4  ;;  %v1277_v39 = vld.sshfl [vmem:[#allocation1] sm:$0xff pattern:$0x75316420]  ;;  %v359_v41 = vadd.f32 %v358_v30, %v357_v7  ;;  %v604_v42 = vrot.slane %v324_v20, 6  ;;  %v605_v43 = vrot.slane %v331_v21, 5 }
  0x5a   : > { %v376_v44 = vadd.f32 %v375_v8, %v374_v0  ;;  %v383_v45 = vadd.f32 %v382_v17, %v381_v5  ;;  %v1280_v46 = vld.sshfl [vmem:[#allocation1 + $0x8] sm:$0xff pattern:$0x75316420]  ;;  %v1282_v47 = vld.sshfl [vmem:[#allocation1 + $0x10] sm:$0xff pattern:$0x75316420]  ;;  %v618_v48 = vsel %vm617_vm1, %v310_v14, %v603_v31  ;;  %v362_v49 = vadd.f32 %v361_v3, %v1261_v53 }
  0x5b   : > { %447 = vst [vmem:[#allocation1] ss:$2 sm:$0xff] %v420_v34  ;;  %v1286_v50 = vld.sshfl [vmem:[#allocation1 + $0x18] sm:$0xff pattern:$0x75316420]  ;;  %v606_v52 = vrot.slane %v338_v29, 4  ;;  %v620_v54 = vsel %vm619_vm2, %v604_v42, %v605_v43  ;;  %v390_v55 = vadd.f32 %v389_v23, %v388_v13  ;;  %v397_v56 = vadd.f32 %v396_v24, %v395_v18 }
  0x5c   : > { %v404_v57 = vadd.f32 %v403_v32, %v402_v28  ;;  %448 = vst [vmem:[#allocation1 + $0x10] ss:$2 sm:$0xff] %v421_v35  ;;  %v1290_v58 = vld.sshfl [vmem:[#allocation1 + $0x20] sm:$0xff pattern:$0x75316420]  ;;  %v607_v59 = vrot.slane %v345_v36, 3  ;;  %v622_v53 = vsel %vm621_vm3, %v618_v48, %v620_v54  ;;  %v411_v4 = vadd.f32 %v410_v38, %v409_v33 }
  0x5d   : > { %v1292_v60 = vld.sshfl [vmem:[#allocation1 + $0x28] sm:$0xff pattern:$0x75316420]  ;;  %v608_v61 = vrot.slane %v352_v37, 2  ;;  %v609_v62 = vrot.slane %v359_v41, 1  ;;  %v363_v63 = vrot.slane %v362_v49, 2 }
  0x5e   : > { %449 = vst [vmem:[#allocation1 + $0x20] ss:$2 sm:$0xff] %v422_v40  ;;  %v624_v0 = vsel %vm623_vm4, %v606_v52, %v607_v59  ;;  %v370_v1 = vrot.slane %v369_v22, 2  ;;  %v377_v2 = vrot.slane %v376_v44, 2  ;;  %v384_v3 = vrot.slane %v383_v45, 2 }
  0x5f   : > { %v1296_v5 = vld.sshfl [vmem:[#allocation1 + $0x30] sm:$0xff pattern:$0x75316420]  ;;  %v1298_v6 = vld.sshfl [vmem:[#allocation1 + $0x38] sm:$0xff pattern:$0x75316420]  ;;  %v626_v7 = vsel %vm625_vm5, %v608_v61, %v609_v62  ;;  %v364_v8 = vadd.f32 %v363_v63, %v362_v49 }
  0x60   : > { %450 = vst [vmem:[#allocation1 + $0x30] ss:$2 sm:$0xff] %v423_v51  ;;  %v628_v9 = vsel %vm627_vm6, %v624_v0, %v626_v7  ;;  %v371_v10 = vadd.f32 %v370_v1, %v369_v22  ;;  %v378_v11 = vadd.f32 %v377_v2, %v376_v44  ;;  %v385_v12 = vadd.f32 %v384_v3, %v383_v45 }
  0x61   : > { %v629_v13 = vsel %vm303_vm0, %v622_v53, %v628_v9  ;;  %v365_v14 = vrot.slane %v364_v8, 1  ;;  %v391_v15 = vrot.slane %v390_v55, 2  ;;  %v398_v16 = vrot.slane %v397_v56, 2 }
  0x62   : > { %639 = vst [vmem:[%s1305_s11] sm:$0xff] %v629_v13  ;;  %v372_v17 = vrot.slane %v371_v10, 1  ;;  %v379_v18 = vrot.slane %v378_v11, 1  ;;  %v386_v19 = vrot.slane %v385_v12, 1  ;;  %v405_v20 = vrot.slane %v404_v57, 2 }
  0x63   : > { %v366_v21 = vadd.f32 %v365_v14, %v364_v8  ;;  %v392_v23 = vadd.f32 %v391_v15, %v390_v55  ;;  %v399_v22 = vadd.f32 %v398_v16, %v397_v56  ;;  %v412_v24 = vrot.slane %v411_v4, 2 }
  0x64   : > { %v373_v25 = vadd.f32 %v372_v17, %v371_v10  ;;  %v380_v26 = vadd.f32 %v379_v18, %v378_v11  ;;  %v387_v27 = vadd.f32 %v386_v19, %v385_v12  ;;  %v406_v28 = vadd.f32 %v405_v20, %v404_v57  ;;  %v451_v18 = vld.sshfl [vmem:[#allocation1] sm:$0xff pattern:$0x75316420] }
  0x65   : > { %v393_v29 = vrot.slane %v392_v23, 1  ;;  %v400_v30 = vrot.slane %v399_v22, 1  ;;  %v413_v31 = vadd.f32 %v412_v24, %v411_v4  ;;  %v475_v32 = vsel %vm303_vm0, %v1277_v39, 0.0 }
  0x66   : > { %v407_v33 = vrot.slane %v406_v28, 1  ;;  %v610_v34 = vrot.slane %v373_v25, 7  ;;  %v611_v35 = vrot.slane %v380_v26, 6  ;;  %v612_v36 = vrot.slane %v387_v27, 5 }
  0x67   : > { %v394_v37 = vadd.f32 %v393_v29, %v392_v23  ;;  %v401_v38 = vadd.f32 %v400_v30, %v399_v22  ;;  %v414_v40 = vrot.slane %v413_v31, 1  ;;  %v476_v41 = vrot.slane %v475_v32, 4 }
  0x68   : > { %v408_v42 = vadd.f32 %v407_v33, %v406_v28  ;;  %v630_v43 = vsel %vm617_vm1, %v366_v21, %v610_v34  ;;  %v631_v44 = vsel %vm619_vm2, %v611_v35, %v612_v36  ;;  %v482_v45 = vsel %vm303_vm0, %v1280_v46, 0.0 }
  0x69   : > { %v415_v39 = vadd.f32 %v414_v40, %v413_v31  ;;  %v613_v48 = vrot.slane %v394_v37, 4  ;;  %v614_v49 = vrot.slane %v401_v38, 3  ;;  %v632_v51 = vsel %vm621_vm3, %v630_v43, %v631_v44 }
  0x6a   : > { %v615_v52 = vrot.slane %v408_v42, 2  ;;  %v477_v54 = vadd.f32 %v476_v41, %v475_v32  ;;  %v483_v55 = vrot.slane %v482_v45, 4  ;;  %v489_v56 = vsel %vm303_vm0, %v1282_v47, 0.0 }
  0x6b   : > { %v616_v57 = vrot.slane %v415_v39, 1  ;;  %v633_v46 = vsel %vm623_vm4, %v613_v48, %v614_v49  ;;  %v490_v59 = vrot.slane %v489_v56, 4  ;;  %v496_v61 = vsel %vm303_vm0, %v1286_v50, 0.0 }
  0x6c   : > { %v478_v62 = vrot.slane %v477_v54, 2  ;;  %v484_v53 = vadd.f32 %v483_v55, %v482_v45  ;;  %v497_v63 = vrot.slane %v496_v61, 4  ;;  %v503_v0 = vsel %vm303_vm0, %v1290_v58, 0.0 }
  0x6d   : > { %v634_v1 = vsel %vm625_vm5, %v615_v52, %v616_v57  ;;  %v491_v2 = vadd.f32 %v490_v59, %v489_v56  ;;  %v504_v47 = vrot.slane %v503_v0, 4  ;;  %v510_v3 = vsel %vm303_vm0, %v1292_v60, 0.0 }
  0x6e   : > { %v635_v4 = vsel %vm627_vm6, %v633_v46, %v634_v1  ;;  %v479_v50 = vadd.f32 %v478_v62, %v477_v54  ;;  %v485_v7 = vrot.slane %v484_v53, 2  ;;  %v498_v8 = vadd.f32 %v497_v63, %v496_v61 }
  0x6f   : > { %v636_v9 = vsel %vm303_vm0, %v632_v51, %v635_v4  ;;  %v492_v10 = vrot.slane %v491_v2, 2  ;;  %v505_v58 = vadd.f32 %v504_v47, %v503_v0  ;;  %v511_v11 = vrot.slane %v510_v3, 4 }
  0x70   : > { %640 = vst [vmem:[%s1305_s11 + $0x8] sm:$0xff] %v636_v9  ;;  %v486_v12 = vadd.f32 %v485_v7, %v484_v53  ;;  %v499_v13 = vrot.slane %v498_v8, 2  ;;  %v517_v60 = vsel %vm303_vm0, %v1296_v5, 0.0 }
  0x71   : > { %v493_v14 = vadd.f32 %v492_v10, %v491_v2  ;;  %v506_v15 = vrot.slane %v505_v58, 2  ;;  %v512_v16 = vadd.f32 %v511_v11, %v510_v3  ;;  %v518_v17 = vrot.slane %v517_v60, 4 }
  0x72   : > { %1015 = shalt.err (!%p1012_p0)
}
  0x73   : > { %876 = dma.vmem_to_hbm [thread:$0]  (%p1162_p11), %s1332_s29, 256, %s710_s5, %s690_s7   ;;  %v480_v5 = vrot.slane %v479_v50, 1  ;;  %v487_v19 = vrot.slane %v486_v12, 1  ;;  %v500_v20 = vadd.f32 %v499_v13, %v498_v8  ;;  %v524_v21 = vsel %vm303_vm0, %v1298_v6, 0.0 }
  0x74   : > { %v494_v23 = vrot.slane %v493_v14, 1  ;;  %v507_v22 = vadd.f32 %v506_v15, %v505_v58  ;;  %v513_v24 = vrot.slane %v512_v16, 2  ;;  %v519_v25 = vadd.f32 %v518_v17, %v517_v60  ;;  %v452_v37 = vld.sshfl [vmem:[#allocation1 + $0x8] sm:$0xff pattern:$0x75316420]  ;;  %s1370_s30 = scalar_lea.vmem [#allocation8], %s862_s23  ;;  %s719_s19 = scalar_lea.hbm %s1419_s3, %s866_s17 }
  0x75   : > { %v488_v26 = vadd.f32 %v487_v19, %v486_v12  ;;  %v501_v27 = vrot.slane %v500_v20, 1  ;;  %v525_v28 = vrot.slane %v524_v21, 4  ;;  %v531_v29 = vsel %vm303_vm0, %v451_v18, 0.0  ;;  %v453_v39 = vld.sshfl [vmem:[#allocation1 + $0x10] sm:$0xff pattern:$0x75316420] }
  0x76   : > { %v495_v30 = vadd.f32 %v494_v23, %v493_v14  ;;  %v508_v31 = vrot.slane %v507_v22, 1  ;;  %v514_v32 = vadd.f32 %v513_v24, %v512_v16  ;;  %v520_v33 = vrot.slane %v519_v25, 2  ;;  %v454_v51 = vld.sshfl [vmem:[#allocation1 + $0x18] sm:$0xff pattern:$0x75316420]  ;;  %s721_s20 = sshll.u32 %s1370_s30, 4  ;;  %s722_s20 = int_to_ptr.vmem [resolvable:$true] %s721_s20 }
  0x77   : > { %v502_v34 = vadd.f32 %v501_v27, %v500_v20  ;;  %v526_v35 = vadd.f32 %v525_v28, %v524_v21  ;;  %v657_v36 = vrot.slane %v488_v26, 7  ;;  %v532_v38 = vrot.slane %v531_v29, 4  ;;  %v455_v46 = vld.sshfl [vmem:[#allocation1 + $0x20] sm:$0xff pattern:$0x75316420]  ;;  %s723_s22 = sshll.u32 %s719_s19, 4  ;;  %s724_s22 = int_to_ptr.hbm [resolvable:$true] %s723_s22 }
  0x78   : > { %v509_v40 = vadd.f32 %v508_v31, %v507_v22  ;;  %v515_v6 = vrot.slane %v514_v32, 1  ;;  %v521_v41 = vadd.f32 %v520_v33, %v519_v25  ;;  %v658_v42 = vrot.slane %v495_v30, 6  ;;  %v456_v53 = vld.sshfl [vmem:[#allocation1 + $0x28] sm:$0xff pattern:$0x75316420]  ;;  %s695_s16 = scalar_lea.sflag [#allocation9], %s1226_s26 }
  0x79   : > { %v481_v43 = vadd.f32 %v480_v5, %v479_v50  ;;  %v527_v44 = vrot.slane %v526_v35, 2  ;;  %v659_v45 = vrot.slane %v502_v34, 5  ;;  %v533_v52 = vadd.f32 %v532_v38, %v531_v29  ;;  %v457_v2 = vld.sshfl [vmem:[#allocation1 + $0x30] sm:$0xff pattern:$0x75316420]  ;;  %s1030_s17 = sshra.s32 %s724_s22, 4  ;;  %s1031_s17 = int_to_ptr.hbm [resolvable:$true] %s1030_s17 }
  0x7a   : > { %v516_v48 = vadd.f32 %v515_v6, %v514_v32  ;;  %v522_v49 = vrot.slane %v521_v41, 1  ;;  %v538_v54 = vsel %vm303_vm0, %v452_v37, 0.0  ;;  %v660_v62 = vrot.slane %v509_v40, 4  ;;  %v458_v58 = vld.sshfl [vmem:[#allocation1 + $0x38] sm:$0xff pattern:$0x75316420]  ;;  %p1037_p5 = scmp.lt.s32.totalorder %s1031_s17, %s1419_s3 }
  0x7b   : > { %v528_v55 = vadd.f32 %v527_v44, %v526_v35  ;;  %v671_v56 = vsel %vm617_vm1, %v481_v43, %v657_v36  ;;  %v672_v57 = vsel %vm619_vm2, %v658_v42, %v659_v45  ;;  %v539_v59 = vrot.slane %v538_v54, 4  ;;  %s1032_s29 = scalar_lea.hbm %s1031_s17, 16  ;;  %s1036_s9 = scalar_lea.hbm %s1419_s3, 32 }
  0x7c   : > { %v523_v61 = vadd.f32 %v522_v49, %v521_v41  ;;  %v545_v63 = vsel %vm303_vm0, %v453_v39, 0.0  ;;  %v661_v1 = vrot.slane %v516_v48, 3  ;;  %v673_v4 = vsel %vm621_vm3, %v671_v56, %v672_v57  ;;  %p1033_p1 = scmp.ne.s32.totalorder %s1031_s17, %s1032_s29  ;;  %p1038_p8 = scmp.lt.s32.totalorder %s1036_s9, %s1032_s29 }
  0x7d   : > { %v529_v0 = vrot.slane %v528_v55, 1  ;;  %v540_v47 = vadd.f32 %v539_v59, %v538_v54  ;;  %v546_v3 = vrot.slane %v545_v63, 4  ;;  %v534_v50 = vrot.slane %v533_v52, 2 }
  0x7e   : > { %v552_v7 = vsel %vm303_vm0, %v454_v51, 0.0  ;;  %v559_v8 = vsel %vm303_vm0, %v455_v46, 0.0  ;;  %v662_v10 = vrot.slane %v523_v61, 2  ;;  %v566_v14 = vsel %vm303_vm0, %v456_v53, 0.0  ;;  %p1034_p4 = pnand %p1033_p1, %p1162_p11  ;;  %p1039_p6 = por %p1038_p8, %p1037_p5 }
  0x7f   : > { %v530_v9 = vadd.f32 %v529_v0, %v528_v55  ;;  %v541_v11 = vrot.slane %v540_v47, 2  ;;  %v547_v12 = vadd.f32 %v546_v3, %v545_v63  ;;  %v553_v13 = vrot.slane %v552_v7, 4 }
  0x80   : > { %v560_v60 = vrot.slane %v559_v8, 4  ;;  %v573_v15 = vsel %vm303_vm0, %v457_v2, 0.0  ;;  %v674_v17 = vsel %vm623_vm4, %v660_v62, %v661_v1  ;;  %v567_v21 = vrot.slane %v566_v14, 4  ;;  %p1035_p7 = pneg %p1034_p4 }
  0x81   : > { %v663_v16 = vrot.slane %v530_v9, 1  ;;  %v542_v18 = vadd.f32 %v541_v11, %v540_v47  ;;  %v548_v5 = vrot.slane %v547_v12, 2  ;;  %v554_v19 = vadd.f32 %v553_v13, %v552_v7 }
  0x82   : > { %v561_v20 = vadd.f32 %v560_v60, %v559_v8  ;;  %v574_v23 = vrot.slane %v573_v15, 4  ;;  %v580_v26 = vsel %vm303_vm0, %v458_v58, 0.0  ;;  %v568_v30 = vadd.f32 %v567_v21, %v566_v14  ;;  %p1040_p13 = pnand %p1039_p6, %p1035_p7 }
  0x83   : > { %v675_v22 = vsel %vm625_vm5, %v662_v10, %v663_v16  ;;  %v543_v24 = vrot.slane %v542_v18, 1  ;;  %v549_v25 = vadd.f32 %v548_v5, %v547_v12  ;;  %v555_v28 = vrot.slane %v554_v19, 2 }
  0x84   : > { %v676_v27 = vsel %vm627_vm6, %v674_v17, %v675_v22  ;;  %v562_v29 = vrot.slane %v561_v20, 2  ;;  %v535_v32 = vadd.f32 %v534_v50, %v533_v52  ;;  %v575_v34 = vadd.f32 %v574_v23, %v573_v15 }
  0x85   : > { %v677_v31 = vsel %vm303_vm0, %v673_v4, %v676_v27  ;;  %v550_v33 = vrot.slane %v549_v25, 1  ;;  %v556_v35 = vadd.f32 %v555_v28, %v554_v19  ;;  %v569_v37 = vrot.slane %v568_v30, 2 }
  0x86   : > { %687 = vst [vmem:[%s1370_s30] sm:$0xff] %v677_v31  ;;  %v563_v36 = vadd.f32 %v562_v29, %v561_v20  ;;  %v581_v38 = vrot.slane %v580_v26, 4  ;;  %v544_v40 = vadd.f32 %v543_v24, %v542_v18  ;;  %v576_v41 = vrot.slane %v575_v34, 2 }
  0x87   : > { %v551_v6 = vadd.f32 %v550_v33, %v549_v25  ;;  %v557_v42 = vrot.slane %v556_v35, 1  ;;  %v570_v44 = vadd.f32 %v569_v37, %v568_v30  ;;  %v536_v39 = vrot.slane %v535_v32, 1 }
  0x88   : > { %v564_v43 = vrot.slane %v563_v36, 1  ;;  %v582_v45 = vadd.f32 %v581_v38, %v580_v26  ;;  %v577_v48 = vadd.f32 %v576_v41, %v575_v34  ;;  %v664_v56 = vrot.slane %v544_v40, 7 }
  0x89   : > { %v558_v49 = vadd.f32 %v557_v42, %v556_v35  ;;  %v571_v52 = vrot.slane %v570_v44, 1  ;;  %v665_v59 = vrot.slane %v551_v6, 6  ;;  %v537_v53 = vadd.f32 %v536_v39, %v535_v32 }
  0x8a   : > { %v565_v51 = vadd.f32 %v564_v43, %v563_v36  ;;  %v583_v54 = vrot.slane %v582_v45, 2  ;;  %v578_v55 = vrot.slane %v577_v48, 1 }
  0x8b   : > { %v572_v57 = vadd.f32 %v571_v52, %v570_v44  ;;  %v666_v61 = vrot.slane %v558_v49, 5  ;;  %v678_v3 = vsel %vm617_vm1, %v537_v53, %v664_v56 }
  0x8c   : > { %v584_v46 = vadd.f32 %v583_v54, %v582_v45  ;;  %v579_v62 = vadd.f32 %v578_v55, %v577_v48  ;;  %v667_v0 = vrot.slane %v565_v51, 4 }
  0x8d   : > { %v668_v1 = vrot.slane %v572_v57, 3  ;;  %v679_v4 = vsel %vm619_vm2, %v665_v59, %v666_v61 }
  0x8e   : > { %v585_v63 = vrot.slane %v584_v46, 1  ;;  %v669_v47 = vrot.slane %v579_v62, 2  ;;  %v680_v8 = vsel %vm621_vm3, %v678_v3, %v679_v4 }
  0x8f   : > { %v681_v7 = vsel %vm623_vm4, %v667_v0, %v668_v1 }
  0x90   : > { %v586_v2 = vadd.f32 %v585_v63, %v584_v46 }
  0x92   : > { %v670_v50 = vrot.slane %v586_v2, 1 }
  0x94   : > { %v682_v9 = vsel %vm625_vm5, %v669_v47, %v670_v50 }
  0x95   : > { %v683_v10 = vsel %vm627_vm6, %v681_v7, %v682_v9 }
  0x96   : > { %v684_v58 = vsel %vm303_vm0, %v680_v8, %v683_v10 }
  0x97   : > { %688 = vst [vmem:[%s1370_s30 + $0x8] sm:$0xff] %v684_v58 }
  0x98   : > { %1043 = shalt.err (!%p1040_p13)
}
  0x99   : > { %877 = dma.vmem_to_hbm [thread:$0]  (%p1162_p11), %s722_s20, 256, %s724_s22, %s695_s16  }
  0x9a PF: > { %s735_s26 = sand.u32 1, %s1078_s12   ;;  %p1426_p3 = scmp.ge.s32.totalorder %s1090_s15, 2 }
  0x9b   : > { %s736_s28 = scalar_lea.sflag [#allocation4], %s735_s26 }
  0x9c   : > { %p888_p10 = pnand %p1426_p3, %p1166_p12 }
  0x9e   : > { %p889_p2 = pneg %p888_p10 }
  0xa0   : > { %1069 = dma.done.wait (%p889_p2), %s736_s28, 256  }
  0xa1   : > { %1071 = vsyncadd (%p889_p2), %s736_s28, 4294967040  ;;  %s746_s6 = scalar_lea.sflag [#allocation9], %s735_s26 }
  0xa2   : > { %1073 = dma.done.wait (%p889_p2), %s746_s6, 256  }
  0xa3   : > { %1075 = vsyncadd (%p889_p2), %s746_s6, 4294967040  ;;  %p23_p11 = scmp.ge.s32.totalorder %s1137_s18, 4   ;;  %s1427_s12 = smov %s1082_s13 }
  0xa4   : > { %s1428_s13 = smov %s1086_s14  ;;  %s1429_s14 = smov %s1149_s21 }
  0xa5   : > { %s1430_s15 = smov %s1137_s18  ;;  %25 = sbr.rel (!%p23_p11) target bundleno = 9 (0x9), region = 109 }
  0xaa   :  { %752 = vsyncpa [#allocation3], 1 }
  0xab   :  { %754 = vsyncpa [#allocation3 + $0x1], 1 }
  0xac   :  { %755 = vsyncpa [#allocation6], 1 }
  0xad   :  { %757 = vsyncpa [#allocation6 + $0x1], 1 }
  0xae   :  { %758 = vsyncpa [#allocation4], 1 }
  0xaf   :  { %760 = vsyncpa [#allocation4 + $0x1], 1 }
  0xb0   :  { %761 = vsyncpa [#allocation9], 1 }
  0xb1   :  { %763 = vsyncpa [#allocation9 + $0x1], 1 }

</bundles_post_ra>
